<compile_context>
chip_gen: v7x
topology: tpu7x:2x2x1
jax: 0.10.0
libtpu: 0.0.40
codegen_flags: <defaults>
</compile_context>

<pallas_src>
import jax
import jax.numpy as jnp
from jax.experimental import pallas as pl
from jax.experimental.pallas import tpu as pltpu

IN_DIM = 2
HID_DIM = 10
OUT_DIM = 2


def generator_kernel(x_ref, w1_ref, b1_ref, w2_ref, b2_ref, o_ref):
    # x_ref:  [IN, TB]   VMEM (batch on lanes)
    # w1_ref: [IN, HID]  SMEM    b1_ref: [HID] SMEM
    # w2_ref: [HID, OUT] SMEM    b2_ref: [OUT] SMEM
    # o_ref:  [OUT, TB]  VMEM
    x = x_ref[...]                                        # (IN, TB) f32
    x_rows = [x[i:i + 1, :] for i in range(IN_DIM)]       # IN x (1, TB)

    # Linear(2, 10) + ReLU -- fully unrolled VPU multiply-adds with SMEM scalars.
    h_rows = []
    for j in range(HID_DIM):
        hj = x_rows[0] * w1_ref[0, j]
        for i in range(1, IN_DIM):
            hj = hj + x_rows[i] * w1_ref[i, j]
        hj = hj + b1_ref[j]
        h_rows.append(jnp.maximum(hj, 0.0))

    # Linear(10, 2) + Sigmoid (exp rides the otherwise-idle EUP slot).
    z_rows = []
    for k in range(OUT_DIM):
        zk = h_rows[0] * w2_ref[0, k]
        for j in range(1, HID_DIM):
            zk = zk + h_rows[j] * w2_ref[j, k]
        zk = zk + b2_ref[k]
        z_rows.append(jax.nn.sigmoid(zk))

    # Single lane-dense store of the whole (OUT, TB) tile.
    o_ref[...] = jnp.concatenate(z_rows, axis=0)


def generator_forward(x, w1, b1, w2, b2, *, block_b=512):
    """x: [B, 2] float32 -> [B, 2] float32.

    block_b: batch tile (lane width) -- multiple of 128.  512 already runs near
    the HBM roofline; footprint is tiny (~8 KiB double-buffered per operand),
    so it is safe against v7x's 64 MiB VMEM as well.
    """
    B = x.shape[0]
    nb = pl.cdiv(B, block_b)
    Bp = nb * block_b

    # Transpose to the lane-dense layout and pad batch to a tile multiple.
    xt = jnp.transpose(x).astype(jnp.float32)             # (IN, B)
    if Bp != B:
        xt = jnp.pad(xt, ((0, 0), (0, Bp - B)))

    smem_spec = pl.BlockSpec(memory_space=pltpu.MemorySpace.SMEM)

    out_t = pl.pallas_call(
        generator_kernel,
        out_shape=jax.ShapeDtypeStruct((OUT_DIM, Bp), jnp.float32),
        grid_spec=pltpu.PrefetchScalarGridSpec(
            num_scalar_prefetch=0,
            grid=(nb,),
            in_specs=[
                pl.BlockSpec((IN_DIM, block_b), lambda i: (0, i)),
                smem_spec,  # w1
                smem_spec,  # b1
                smem_spec,  # w2
                smem_spec,  # b2
            ],
            out_specs=pl.BlockSpec((OUT_DIM, block_b), lambda i: (0, i)),
        ),
        compiler_params=pltpu.CompilerParams(
            # Batch tiles are independent -> megacore-shardable on v7x.
            dimension_semantics=("parallel",),
        ),
        cost_estimate=pl.CostEstimate(
            flops=2 * Bp * (IN_DIM * HID_DIM + HID_DIM * OUT_DIM),
            transcendentals=Bp * OUT_DIM,
            bytes_accessed=4 * Bp * (IN_DIM + OUT_DIM)
            + 4 * (IN_DIM * HID_DIM + HID_DIM + HID_DIM * OUT_DIM + OUT_DIM),
        ),
    )(xt, w1, b1, w2, b2)

    # Slice off padding and return in the original [B, OUT] layout.
    return jnp.transpose(out_t[:, :B])


def init_params(key):
    """Deterministic Xavier-normal weights, zero biases (matches init_weights)."""
    k1, k2 = jax.random.split(key)
    # xavier_normal_: std = sqrt(2 / (fan_in + fan_out))
    std1 = (2.0 / (IN_DIM + HID_DIM)) ** 0.5
    std2 = (2.0 / (HID_DIM + OUT_DIM)) ** 0.5
    # stored as [in, out] (transpose of torch's [out, in])
    w1 = std1 * jax.random.normal(k1, (IN_DIM, HID_DIM), dtype=jnp.float32)
    b1 = jnp.zeros((HID_DIM,), dtype=jnp.float32)
    w2 = std2 * jax.random.normal(k2, (HID_DIM, OUT_DIM), dtype=jnp.float32)
    b2 = jnp.zeros((OUT_DIM,), dtype=jnp.float32)
    return w1, b1, w2, b2


def reference_forward(x, w1, b1, w2, b2):
    h = jnp.maximum(x @ w1 + b1, 0.0)
    return jax.nn.sigmoid(h @ w2 + b2)


if __name__ == "__main__":
    key = jax.random.PRNGKey(0)
    kx, kp = jax.random.split(key)

    B = 8
    x = jax.random.normal(kx, (B, IN_DIM), dtype=jnp.float32)
    w1, b1, w2, b2 = init_params(kp)

    out = generator_forward(x, w1, b1, w2, b2)
    out = jax.block_until_ready(out)

    ref = reference_forward(x, w1, b1, w2, b2)
    assert out.shape == (B, OUT_DIM)
    assert jnp.allclose(out, ref, atol=1e-5, rtol=1e-5), "mismatch vs reference"

    print("KERNEL_OK")
</pallas_src>

<mosaic_0001>
module attributes {stable_mosaic.version = 11 : i64} {
  func.func @generator_kernel(%arg0: i32, %arg1: memref<2x512xf32, #tpu.memory_space<vmem>>, %arg2: memref<2x10xf32, #tpu.memory_space<smem>>, %arg3: memref<10xf32, #tpu.memory_space<smem>>, %arg4: memref<10x2xf32, #tpu.memory_space<smem>>, %arg5: memref<2xf32, #tpu.memory_space<smem>>, %arg6: memref<2x512xf32, #tpu.memory_space<vmem>>) attributes {dimension_semantics = [#tpu.dimension_semantics<parallel>], iteration_bounds = array<i64: 1>, scalar_prefetch = 0 : i64, scratch_operands = 0 : i64, tpu.core_type = #tpu.core_type<tc>, window_params = [{transform_indices = @transform_0, window_bounds = array<i64: 2, 512>}, {transform_indices = @transform_1, window_bounds = array<i64: 2, 10>}, {transform_indices = @transform_2, window_bounds = array<i64: 10>}, {transform_indices = @transform_3, window_bounds = array<i64: 10, 2>}, {transform_indices = @transform_4, window_bounds = array<i64: 2>}, {transform_indices = @transform_5, window_bounds = array<i64: 2, 512>}]} {
    %c0 = arith.constant 0 : index
    %c0_0 = arith.constant 0 : index
    %0 = vector.load %arg1[%c0, %c0_0] : memref<2x512xf32, #tpu.memory_space<vmem>>, vector<2x512xf32>
    %1 = vector.extract_strided_slice %0 {offsets = [0, 0], sizes = [1, 512], strides = [1, 1]} : vector<2x512xf32> to vector<1x512xf32>
    %2 = vector.extract_strided_slice %0 {offsets = [1, 0], sizes = [1, 512], strides = [1, 1]} : vector<2x512xf32> to vector<1x512xf32>
    %c0_1 = arith.constant 0 : index
    %c0_2 = arith.constant 0 : index
    %3 = memref.load %arg2[%c0_1, %c0_2] : memref<2x10xf32, #tpu.memory_space<smem>>
    %4 = vector.broadcast %3 : f32 to vector<1x512xf32>
    %5 = arith.mulf %1, %4 : vector<1x512xf32>
    %c1 = arith.constant 1 : index
    %c0_3 = arith.constant 0 : index
    %6 = memref.load %arg2[%c1, %c0_3] : memref<2x10xf32, #tpu.memory_space<smem>>
    %7 = vector.broadcast %6 : f32 to vector<1x512xf32>
    %8 = arith.mulf %2, %7 : vector<1x512xf32>
    %9 = arith.addf %5, %8 : vector<1x512xf32>
    %c0_4 = arith.constant 0 : index
    %10 = memref.load %arg3[%c0_4] : memref<10xf32, #tpu.memory_space<smem>>
    %11 = vector.broadcast %10 : f32 to vector<1x512xf32>
    %12 = arith.addf %9, %11 : vector<1x512xf32>
    %cst = arith.constant 0.000000e+00 : f32
    %13 = vector.broadcast %cst : f32 to vector<1x512xf32>
    %14 = arith.maximumf %12, %13 : vector<1x512xf32>
    %c0_5 = arith.constant 0 : index
    %c1_6 = arith.constant 1 : index
    %15 = memref.load %arg2[%c0_5, %c1_6] : memref<2x10xf32, #tpu.memory_space<smem>>
    %16 = vector.broadcast %15 : f32 to vector<1x512xf32>
    %17 = arith.mulf %1, %16 : vector<1x512xf32>
    %c1_7 = arith.constant 1 : index
    %c1_8 = arith.constant 1 : index
    %18 = memref.load %arg2[%c1_7, %c1_8] : memref<2x10xf32, #tpu.memory_space<smem>>
    %19 = vector.broadcast %18 : f32 to vector<1x512xf32>
    %20 = arith.mulf %2, %19 : vector<1x512xf32>
    %21 = arith.addf %17, %20 : vector<1x512xf32>
    %c1_9 = arith.constant 1 : index
    %22 = memref.load %arg3[%c1_9] : memref<10xf32, #tpu.memory_space<smem>>
    %23 = vector.broadcast %22 : f32 to vector<1x512xf32>
    %24 = arith.addf %21, %23 : vector<1x512xf32>
    %cst_10 = arith.constant 0.000000e+00 : f32
    %25 = vector.broadcast %cst_10 : f32 to vector<1x512xf32>
    %26 = arith.maximumf %24, %25 : vector<1x512xf32>
    %c0_11 = arith.constant 0 : index
    %c2 = arith.constant 2 : index
    %27 = memref.load %arg2[%c0_11, %c2] : memref<2x10xf32, #tpu.memory_space<smem>>
    %28 = vector.broadcast %27 : f32 to vector<1x512xf32>
    %29 = arith.mulf %1, %28 : vector<1x512xf32>
    %c1_12 = arith.constant 1 : index
    %c2_13 = arith.constant 2 : index
    %30 = memref.load %arg2[%c1_12, %c2_13] : memref<2x10xf32, #tpu.memory_space<smem>>
    %31 = vector.broadcast %30 : f32 to vector<1x512xf32>
    %32 = arith.mulf %2, %31 : vector<1x512xf32>
    %33 = arith.addf %29, %32 : vector<1x512xf32>
    %c2_14 = arith.constant 2 : index
    %34 = memref.load %arg3[%c2_14] : memref<10xf32, #tpu.memory_space<smem>>
    %35 = vector.broadcast %34 : f32 to vector<1x512xf32>
    %36 = arith.addf %33, %35 : vector<1x512xf32>
    %cst_15 = arith.constant 0.000000e+00 : f32
    %37 = vector.broadcast %cst_15 : f32 to vector<1x512xf32>
    %38 = arith.maximumf %36, %37 : vector<1x512xf32>
    %c0_16 = arith.constant 0 : index
    %c3 = arith.constant 3 : index
    %39 = memref.load %arg2[%c0_16, %c3] : memref<2x10xf32, #tpu.memory_space<smem>>
    %40 = vector.broadcast %39 : f32 to vector<1x512xf32>
    %41 = arith.mulf %1, %40 : vector<1x512xf32>
    %c1_17 = arith.constant 1 : index
    %c3_18 = arith.constant 3 : index
    %42 = memref.load %arg2[%c1_17, %c3_18] : memref<2x10xf32, #tpu.memory_space<smem>>
    %43 = vector.broadcast %42 : f32 to vector<1x512xf32>
    %44 = arith.mulf %2, %43 : vector<1x512xf32>
    %45 = arith.addf %41, %44 : vector<1x512xf32>
    %c3_19 = arith.constant 3 : index
    %46 = memref.load %arg3[%c3_19] : memref<10xf32, #tpu.memory_space<smem>>
    %47 = vector.broadcast %46 : f32 to vector<1x512xf32>
    %48 = arith.addf %45, %47 : vector<1x512xf32>
    %cst_20 = arith.constant 0.000000e+00 : f32
    %49 = vector.broadcast %cst_20 : f32 to vector<1x512xf32>
    %50 = arith.maximumf %48, %49 : vector<1x512xf32>
    %c0_21 = arith.constant 0 : index
    %c4 = arith.constant 4 : index
    %51 = memref.load %arg2[%c0_21, %c4] : memref<2x10xf32, #tpu.memory_space<smem>>
    %52 = vector.broadcast %51 : f32 to vector<1x512xf32>
    %53 = arith.mulf %1, %52 : vector<1x512xf32>
    %c1_22 = arith.constant 1 : index
    %c4_23 = arith.constant 4 : index
    %54 = memref.load %arg2[%c1_22, %c4_23] : memref<2x10xf32, #tpu.memory_space<smem>>
    %55 = vector.broadcast %54 : f32 to vector<1x512xf32>
    %56 = arith.mulf %2, %55 : vector<1x512xf32>
    %57 = arith.addf %53, %56 : vector<1x512xf32>
    %c4_24 = arith.constant 4 : index
    %58 = memref.load %arg3[%c4_24] : memref<10xf32, #tpu.memory_space<smem>>
    %59 = vector.broadcast %58 : f32 to vector<1x512xf32>
    %60 = arith.addf %57, %59 : vector<1x512xf32>
    %cst_25 = arith.constant 0.000000e+00 : f32
    %61 = vector.broadcast %cst_25 : f32 to vector<1x512xf32>
    %62 = arith.maximumf %60, %61 : vector<1x512xf32>
    %c0_26 = arith.constant 0 : index
    %c5 = arith.constant 5 : index
    %63 = memref.load %arg2[%c0_26, %c5] : memref<2x10xf32, #tpu.memory_space<smem>>
    %64 = vector.broadcast %63 : f32 to vector<1x512xf32>
    %65 = arith.mulf %1, %64 : vector<1x512xf32>
    %c1_27 = arith.constant 1 : index
    %c5_28 = arith.constant 5 : index
    %66 = memref.load %arg2[%c1_27, %c5_28] : memref<2x10xf32, #tpu.memory_space<smem>>
    %67 = vector.broadcast %66 : f32 to vector<1x512xf32>
    %68 = arith.mulf %2, %67 : vector<1x512xf32>
    %69 = arith.addf %65, %68 : vector<1x512xf32>
    %c5_29 = arith.constant 5 : index
    %70 = memref.load %arg3[%c5_29] : memref<10xf32, #tpu.memory_space<smem>>
    %71 = vector.broadcast %70 : f32 to vector<1x512xf32>
    %72 = arith.addf %69, %71 : vector<1x512xf32>
    %cst_30 = arith.constant 0.000000e+00 : f32
    %73 = vector.broadcast %cst_30 : f32 to vector<1x512xf32>
    %74 = arith.maximumf %72, %73 : vector<1x512xf32>
    %c0_31 = arith.constant 0 : index
    %c6 = arith.constant 6 : index
    %75 = memref.load %arg2[%c0_31, %c6] : memref<2x10xf32, #tpu.memory_space<smem>>
    %76 = vector.broadcast %75 : f32 to vector<1x512xf32>
    %77 = arith.mulf %1, %76 : vector<1x512xf32>
    %c1_32 = arith.constant 1 : index
    %c6_33 = arith.constant 6 : index
    %78 = memref.load %arg2[%c1_32, %c6_33] : memref<2x10xf32, #tpu.memory_space<smem>>
    %79 = vector.broadcast %78 : f32 to vector<1x512xf32>
    %80 = arith.mulf %2, %79 : vector<1x512xf32>
    %81 = arith.addf %77, %80 : vector<1x512xf32>
    %c6_34 = arith.constant 6 : index
    %82 = memref.load %arg3[%c6_34] : memref<10xf32, #tpu.memory_space<smem>>
    %83 = vector.broadcast %82 : f32 to vector<1x512xf32>
    %84 = arith.addf %81, %83 : vector<1x512xf32>
    %cst_35 = arith.constant 0.000000e+00 : f32
    %85 = vector.broadcast %cst_35 : f32 to vector<1x512xf32>
    %86 = arith.maximumf %84, %85 : vector<1x512xf32>
    %c0_36 = arith.constant 0 : index
    %c7 = arith.constant 7 : index
    %87 = memref.load %arg2[%c0_36, %c7] : memref<2x10xf32, #tpu.memory_space<smem>>
    %88 = vector.broadcast %87 : f32 to vector<1x512xf32>
    %89 = arith.mulf %1, %88 : vector<1x512xf32>
    %c1_37 = arith.constant 1 : index
    %c7_38 = arith.constant 7 : index
    %90 = memref.load %arg2[%c1_37, %c7_38] : memref<2x10xf32, #tpu.memory_space<smem>>
    %91 = vector.broadcast %90 : f32 to vector<1x512xf32>
    %92 = arith.mulf %2, %91 : vector<1x512xf32>
    %93 = arith.addf %89, %92 : vector<1x512xf32>
    %c7_39 = arith.constant 7 : index
    %94 = memref.load %arg3[%c7_39] : memref<10xf32, #tpu.memory_space<smem>>
    %95 = vector.broadcast %94 : f32 to vector<1x512xf32>
    %96 = arith.addf %93, %95 : vector<1x512xf32>
    %cst_40 = arith.constant 0.000000e+00 : f32
    %97 = vector.broadcast %cst_40 : f32 to vector<1x512xf32>
    %98 = arith.maximumf %96, %97 : vector<1x512xf32>
    %c0_41 = arith.constant 0 : index
    %c8 = arith.constant 8 : index
    %99 = memref.load %arg2[%c0_41, %c8] : memref<2x10xf32, #tpu.memory_space<smem>>
    %100 = vector.broadcast %99 : f32 to vector<1x512xf32>
    %101 = arith.mulf %1, %100 : vector<1x512xf32>
    %c1_42 = arith.constant 1 : index
    %c8_43 = arith.constant 8 : index
    %102 = memref.load %arg2[%c1_42, %c8_43] : memref<2x10xf32, #tpu.memory_space<smem>>
    %103 = vector.broadcast %102 : f32 to vector<1x512xf32>
    %104 = arith.mulf %2, %103 : vector<1x512xf32>
    %105 = arith.addf %101, %104 : vector<1x512xf32>
    %c8_44 = arith.constant 8 : index
    %106 = memref.load %arg3[%c8_44] : memref<10xf32, #tpu.memory_space<smem>>
    %107 = vector.broadcast %106 : f32 to vector<1x512xf32>
    %108 = arith.addf %105, %107 : vector<1x512xf32>
    %cst_45 = arith.constant 0.000000e+00 : f32
    %109 = vector.broadcast %cst_45 : f32 to vector<1x512xf32>
    %110 = arith.maximumf %108, %109 : vector<1x512xf32>
    %c0_46 = arith.constant 0 : index
    %c9 = arith.constant 9 : index
    %111 = memref.load %arg2[%c0_46, %c9] : memref<2x10xf32, #tpu.memory_space<smem>>
    %112 = vector.broadcast %111 : f32 to vector<1x512xf32>
    %113 = arith.mulf %1, %112 : vector<1x512xf32>
    %c1_47 = arith.constant 1 : index
    %c9_48 = arith.constant 9 : index
    %114 = memref.load %arg2[%c1_47, %c9_48] : memref<2x10xf32, #tpu.memory_space<smem>>
    %115 = vector.broadcast %114 : f32 to vector<1x512xf32>
    %116 = arith.mulf %2, %115 : vector<1x512xf32>
    %117 = arith.addf %113, %116 : vector<1x512xf32>
    %c9_49 = arith.constant 9 : index
    %118 = memref.load %arg3[%c9_49] : memref<10xf32, #tpu.memory_space<smem>>
    %119 = vector.broadcast %118 : f32 to vector<1x512xf32>
    %120 = arith.addf %117, %119 : vector<1x512xf32>
    %cst_50 = arith.constant 0.000000e+00 : f32
    %121 = vector.broadcast %cst_50 : f32 to vector<1x512xf32>
    %122 = arith.maximumf %120, %121 : vector<1x512xf32>
    %c0_51 = arith.constant 0 : index
    %c0_52 = arith.constant 0 : index
    %123 = memref.load %arg4[%c0_51, %c0_52] : memref<10x2xf32, #tpu.memory_space<smem>>
    %124 = vector.broadcast %123 : f32 to vector<1x512xf32>
    %125 = arith.mulf %14, %124 : vector<1x512xf32>
    %c1_53 = arith.constant 1 : index
    %c0_54 = arith.constant 0 : index
    %126 = memref.load %arg4[%c1_53, %c0_54] : memref<10x2xf32, #tpu.memory_space<smem>>
    %127 = vector.broadcast %126 : f32 to vector<1x512xf32>
    %128 = arith.mulf %26, %127 : vector<1x512xf32>
    %129 = arith.addf %125, %128 : vector<1x512xf32>
    %c2_55 = arith.constant 2 : index
    %c0_56 = arith.constant 0 : index
    %130 = memref.load %arg4[%c2_55, %c0_56] : memref<10x2xf32, #tpu.memory_space<smem>>
    %131 = vector.broadcast %130 : f32 to vector<1x512xf32>
    %132 = arith.mulf %38, %131 : vector<1x512xf32>
    %133 = arith.addf %129, %132 : vector<1x512xf32>
    %c3_57 = arith.constant 3 : index
    %c0_58 = arith.constant 0 : index
    %134 = memref.load %arg4[%c3_57, %c0_58] : memref<10x2xf32, #tpu.memory_space<smem>>
    %135 = vector.broadcast %134 : f32 to vector<1x512xf32>
    %136 = arith.mulf %50, %135 : vector<1x512xf32>
    %137 = arith.addf %133, %136 : vector<1x512xf32>
    %c4_59 = arith.constant 4 : index
    %c0_60 = arith.constant 0 : index
    %138 = memref.load %arg4[%c4_59, %c0_60] : memref<10x2xf32, #tpu.memory_space<smem>>
    %139 = vector.broadcast %138 : f32 to vector<1x512xf32>
    %140 = arith.mulf %62, %139 : vector<1x512xf32>
    %141 = arith.addf %137, %140 : vector<1x512xf32>
    %c5_61 = arith.constant 5 : index
    %c0_62 = arith.constant 0 : index
    %142 = memref.load %arg4[%c5_61, %c0_62] : memref<10x2xf32, #tpu.memory_space<smem>>
    %143 = vector.broadcast %142 : f32 to vector<1x512xf32>
    %144 = arith.mulf %74, %143 : vector<1x512xf32>
    %145 = arith.addf %141, %144 : vector<1x512xf32>
    %c6_63 = arith.constant 6 : index
    %c0_64 = arith.constant 0 : index
    %146 = memref.load %arg4[%c6_63, %c0_64] : memref<10x2xf32, #tpu.memory_space<smem>>
    %147 = vector.broadcast %146 : f32 to vector<1x512xf32>
    %148 = arith.mulf %86, %147 : vector<1x512xf32>
    %149 = arith.addf %145, %148 : vector<1x512xf32>
    %c7_65 = arith.constant 7 : index
    %c0_66 = arith.constant 0 : index
    %150 = memref.load %arg4[%c7_65, %c0_66] : memref<10x2xf32, #tpu.memory_space<smem>>
    %151 = vector.broadcast %150 : f32 to vector<1x512xf32>
    %152 = arith.mulf %98, %151 : vector<1x512xf32>
    %153 = arith.addf %149, %152 : vector<1x512xf32>
    %c8_67 = arith.constant 8 : index
    %c0_68 = arith.constant 0 : index
    %154 = memref.load %arg4[%c8_67, %c0_68] : memref<10x2xf32, #tpu.memory_space<smem>>
    %155 = vector.broadcast %154 : f32 to vector<1x512xf32>
    %156 = arith.mulf %110, %155 : vector<1x512xf32>
    %157 = arith.addf %153, %156 : vector<1x512xf32>
    %c9_69 = arith.constant 9 : index
    %c0_70 = arith.constant 0 : index
    %158 = memref.load %arg4[%c9_69, %c0_70] : memref<10x2xf32, #tpu.memory_space<smem>>
    %159 = vector.broadcast %158 : f32 to vector<1x512xf32>
    %160 = arith.mulf %122, %159 : vector<1x512xf32>
    %161 = arith.addf %157, %160 : vector<1x512xf32>
    %c0_71 = arith.constant 0 : index
    %162 = memref.load %arg5[%c0_71] : memref<2xf32, #tpu.memory_space<smem>>
    %163 = vector.broadcast %162 : f32 to vector<1x512xf32>
    %164 = arith.addf %161, %163 : vector<1x512xf32>
    %165 = arith.negf %164 : vector<1x512xf32>
    %166 = math.exp %165 : vector<1x512xf32>
    %cst_72 = arith.constant 1.000000e+00 : f32
    %167 = vector.broadcast %cst_72 : f32 to vector<1x512xf32>
    %168 = arith.addf %167, %166 : vector<1x512xf32>
    %169 = arith.divf %167, %168 : vector<1x512xf32>
    %c0_73 = arith.constant 0 : index
    %c1_74 = arith.constant 1 : index
    %170 = memref.load %arg4[%c0_73, %c1_74] : memref<10x2xf32, #tpu.memory_space<smem>>
    %171 = vector.broadcast %170 : f32 to vector<1x512xf32>
    %172 = arith.mulf %14, %171 : vector<1x512xf32>
    %c1_75 = arith.constant 1 : index
    %c1_76 = arith.constant 1 : index
    %173 = memref.load %arg4[%c1_75, %c1_76] : memref<10x2xf32, #tpu.memory_space<smem>>
    %174 = vector.broadcast %173 : f32 to vector<1x512xf32>
    %175 = arith.mulf %26, %174 : vector<1x512xf32>
    %176 = arith.addf %172, %175 : vector<1x512xf32>
    %c2_77 = arith.constant 2 : index
    %c1_78 = arith.constant 1 : index
    %177 = memref.load %arg4[%c2_77, %c1_78] : memref<10x2xf32, #tpu.memory_space<smem>>
    %178 = vector.broadcast %177 : f32 to vector<1x512xf32>
    %179 = arith.mulf %38, %178 : vector<1x512xf32>
    %180 = arith.addf %176, %179 : vector<1x512xf32>
    %c3_79 = arith.constant 3 : index
    %c1_80 = arith.constant 1 : index
    %181 = memref.load %arg4[%c3_79, %c1_80] : memref<10x2xf32, #tpu.memory_space<smem>>
    %182 = vector.broadcast %181 : f32 to vector<1x512xf32>
    %183 = arith.mulf %50, %182 : vector<1x512xf32>
    %184 = arith.addf %180, %183 : vector<1x512xf32>
    %c4_81 = arith.constant 4 : index
    %c1_82 = arith.constant 1 : index
    %185 = memref.load %arg4[%c4_81, %c1_82] : memref<10x2xf32, #tpu.memory_space<smem>>
    %186 = vector.broadcast %185 : f32 to vector<1x512xf32>
    %187 = arith.mulf %62, %186 : vector<1x512xf32>
    %188 = arith.addf %184, %187 : vector<1x512xf32>
    %c5_83 = arith.constant 5 : index
    %c1_84 = arith.constant 1 : index
    %189 = memref.load %arg4[%c5_83, %c1_84] : memref<10x2xf32, #tpu.memory_space<smem>>
    %190 = vector.broadcast %189 : f32 to vector<1x512xf32>
    %191 = arith.mulf %74, %190 : vector<1x512xf32>
    %192 = arith.addf %188, %191 : vector<1x512xf32>
    %c6_85 = arith.constant 6 : index
    %c1_86 = arith.constant 1 : index
    %193 = memref.load %arg4[%c6_85, %c1_86] : memref<10x2xf32, #tpu.memory_space<smem>>
    %194 = vector.broadcast %193 : f32 to vector<1x512xf32>
    %195 = arith.mulf %86, %194 : vector<1x512xf32>
    %196 = arith.addf %192, %195 : vector<1x512xf32>
    %c7_87 = arith.constant 7 : index
    %c1_88 = arith.constant 1 : index
    %197 = memref.load %arg4[%c7_87, %c1_88] : memref<10x2xf32, #tpu.memory_space<smem>>
    %198 = vector.broadcast %197 : f32 to vector<1x512xf32>
    %199 = arith.mulf %98, %198 : vector<1x512xf32>
    %200 = arith.addf %196, %199 : vector<1x512xf32>
    %c8_89 = arith.constant 8 : index
    %c1_90 = arith.constant 1 : index
    %201 = memref.load %arg4[%c8_89, %c1_90] : memref<10x2xf32, #tpu.memory_space<smem>>
    %202 = vector.broadcast %201 : f32 to vector<1x512xf32>
    %203 = arith.mulf %110, %202 : vector<1x512xf32>
    %204 = arith.addf %200, %203 : vector<1x512xf32>
    %c9_91 = arith.constant 9 : index
    %c1_92 = arith.constant 1 : index
    %205 = memref.load %arg4[%c9_91, %c1_92] : memref<10x2xf32, #tpu.memory_space<smem>>
    %206 = vector.broadcast %205 : f32 to vector<1x512xf32>
    %207 = arith.mulf %122, %206 : vector<1x512xf32>
    %208 = arith.addf %204, %207 : vector<1x512xf32>
    %c1_93 = arith.constant 1 : index
    %209 = memref.load %arg5[%c1_93] : memref<2xf32, #tpu.memory_space<smem>>
    %210 = vector.broadcast %209 : f32 to vector<1x512xf32>
    %211 = arith.addf %208, %210 : vector<1x512xf32>
    %212 = arith.negf %211 : vector<1x512xf32>
    %213 = math.exp %212 : vector<1x512xf32>
    %cst_94 = arith.constant 1.000000e+00 : f32
    %214 = vector.broadcast %cst_94 : f32 to vector<1x512xf32>
    %215 = arith.addf %214, %213 : vector<1x512xf32>
    %216 = arith.divf %214, %215 : vector<1x512xf32>
    %217 = tpu.concatenate %169, %216 in 0 : vector<1x512xf32>, vector<1x512xf32> -> vector<2x512xf32>
    %c0_95 = arith.constant 0 : index
    %c0_96 = arith.constant 0 : index
    %218 = vector.load %arg6[%c0_95, %c0_96] : memref<2x512xf32, #tpu.memory_space<vmem>>, vector<2x512xf32>
    tpu.vector_store %arg6[%c0_95, %c0_96], %217 {strides = array<i32>} : memref<2x512xf32, #tpu.memory_space<vmem>>, vector<2x512xf32>,
    return
  }
  func.func @transform_0(%arg0: i32) -> (i32, i32) {
    %c0_i32 = arith.constant 0 : i32
    %c0_i32_0 = arith.constant 0 : i32
    return %c0_i32, %arg0 : i32, i32
  }
  func.func @transform_1(%arg0: i32) -> (i32, i32) {
    %c0_i32 = arith.constant 0 : i32
    %c0_i32_0 = arith.constant 0 : i32
    %c0_i32_1 = arith.constant 0 : i32
    return %c0_i32, %c0_i32_0 : i32, i32
  }
  func.func @transform_2(%arg0: i32) -> i32 {
    %c0_i32 = arith.constant 0 : i32
    %c0_i32_0 = arith.constant 0 : i32
    return %c0_i32 : i32
  }
  func.func @transform_3(%arg0: i32) -> (i32, i32) {
    %c0_i32 = arith.constant 0 : i32
    %c0_i32_0 = arith.constant 0 : i32
    %c0_i32_1 = arith.constant 0 : i32
    return %c0_i32, %c0_i32_0 : i32, i32
  }
  func.func @transform_4(%arg0: i32) -> i32 {
    %c0_i32 = arith.constant 0 : i32
    %c0_i32_0 = arith.constant 0 : i32
    return %c0_i32 : i32
  }
  func.func @transform_5(%arg0: i32) -> (i32, i32) {
    %c0_i32 = arith.constant 0 : i32
    %c0_i32_0 = arith.constant 0 : i32
    return %c0_i32, %arg0 : i32, i32
  }
}

</mosaic_0001>

<bundles_post_ra>
// kernel: tpu_custom_call.1
= control target key start
LH: loop header
LB: loop body
LE: loop exit
PB: predicated region body
PF: predicated region fallthrough
CT: control target
= control target key end

     0   :  { %10 = vsyncpa [#allocation4], 0  ;;  %s811_s0 = inlined_call_operand.vmem [shape: f32[2,512], index: 0, kind: input, shape index: {}]   ;;  %s812_s1 = inlined_call_operand.vmem [shape: f32[2,10], index: 1, kind: input, shape index: {}]   ;;  %s813_s2 = inlined_call_operand.vmem [shape: f32[10], index: 2, kind: input, shape index: {}]   ;;  %s814_s3 = inlined_call_operand.vmem [shape: f32[10,2], index: 3, kind: input, shape index: {}]   ;;  %s815_s4 = inlined_call_operand.vmem [shape: f32[2], index: 4, kind: input, shape index: {}]   ;;  %s816_s5 = inlined_call_operand.hbm [shape: f32[2,512], index: 5, kind: output, shape index: {}]  }
   0x1   :  { %11 = vsyncpa [#allocation6], 0 }
   0x2   :  { %12 = vsyncpa [#allocation9], 0  ;;  %s32_s20 = sshll.u32 %s813_s2, 4  ;;  %s33_s20 = int_to_ptr.vmem [resolvable:$true] %s32_s20 }
   0x3   :  { %13 = vsyncpa [#allocation3], 0  ;;  %s22_s23 = sshll.u32 %s812_s1, 4  ;;  %s481_s24 = scalar_lea.vmem %s33_s20, 16  ;;  %s23_s23 = int_to_ptr.vmem [resolvable:$true] %s22_s23 }
   0x4   :  { %p482_p0 = scmp.ne.s32.totalorder %s33_s20, %s481_s24  ;;  %p486_p1 = scmp.lt.s32.totalorder %s33_s20, %s33_s20 }
   0x5   :  { %p487_p2 = scmp.lt.s32.totalorder %s481_s24, %s481_s24 }
   0x7   :  { %p488_p3 = por %p487_p2, %p486_p1 }
   0x9   :  { %p489_p4 = pnand %p488_p3, %p482_p0 }
   0xb   :  { %492 = shalt.err (!%p489_p4)
}
   0xc   :  { %s559_s25 = smov [#allocation5]   ;;  %s493_s26 = scalar_lea.vmem %s23_s23, 32 }
   0xd   :  { %35 = dma.vmem_to_smem %s33_s20, 16, %s559_s25, [#allocation6]  }
   0xe   :  { %p494_p5 = scmp.ne.s32.totalorder %s23_s23, %s493_s26  ;;  %p498_p6 = scmp.lt.s32.totalorder %s23_s23, %s23_s23 }
   0xf   :  { %p499_p7 = scmp.lt.s32.totalorder %s493_s26, %s493_s26 }
  0x11   :  { %p500_p8 = por %p499_p7, %p498_p6 }
  0x13   :  { %p501_p9 = pnand %p500_p8, %p494_p5 }
  0x15   :  { %504 = shalt.err (!%p501_p9)
}
  0x16   :  { %s560_s2 = smov [#allocation2]   ;;  %s41_s28 = sshll.u32 %s814_s3, 4  ;;  %s42_s28 = int_to_ptr.vmem [resolvable:$true] %s41_s28 }
  0x17   :  { %25 = dma.vmem_to_smem %s23_s23, 32, %s560_s2, [#allocation4]  }
  0x18   :  { %s54_s6 = sshll.u32 %s815_s4, 4  ;;  %s505_s7 = scalar_lea.vmem %s42_s28, 256  ;;  %s55_s6 = int_to_ptr.vmem [resolvable:$true] %s54_s6 }
  0x19   :  { %p506_p10 = scmp.ne.s32.totalorder %s42_s28, %s505_s7  ;;  %p510_p11 = scmp.lt.s32.totalorder %s42_s28, %s42_s28 }
  0x1a   :  { %p511_p12 = scmp.lt.s32.totalorder %s505_s7, %s505_s7 }
  0x1c   :  { %p512_p13 = por %p511_p12, %p510_p11 }
  0x1e   :  { %p513_p0 = pnand %p512_p13, %p506_p10 }
  0x20   :  { %516 = shalt.err (!%p513_p0)
}
  0x21   :  { %s561_s8 = smov [#allocation7]   ;;  %s562_s9 = smov 128  }
  0x22   :  { %s563_s10 = smov 8   ;;  %s517_s11 = scalar_lea.vmem %s55_s6, 16 }
  0x23   :  { %47 = dma.vmem_to_smem %s42_s28, 256, %s561_s8, [#allocation6], %s562_s9, %s562_s9, %s563_s10  }
  0x24   :  { %p518_p1 = scmp.ne.s32.totalorder %s55_s6, %s517_s11  ;;  %p522_p2 = scmp.lt.s32.totalorder %s55_s6, %s55_s6 }
  0x25   :  { %p523_p3 = scmp.lt.s32.totalorder %s517_s11, %s517_s11 }
  0x27   :  { %p524_p4 = por %p523_p3, %p522_p2 }
  0x29   :  { %p525_p5 = pnand %p524_p4, %p518_p1 }
  0x2b   :  { %528 = shalt.err (!%p525_p5)
}
  0x2c   :  { %s564_s3 = smov [#allocation8]  }
  0x2d   :  { %57 = dma.vmem_to_smem %s55_s6, 16, %s564_s3, [#allocation9]  }
  0x2e   :  { %551 = dma.done.wait [#allocation4], 32  }
  0x2f   :  { %552 = vsyncadd [#allocation4], 4294967264 }
  0x30   :  { %553 = dma.done.wait [#allocation6], 272  }
  0x31   :  { %554 = vsyncadd [#allocation6], 4294967024 }
  0x32   :  { %555 = dma.done.wait [#allocation9], 16  }
  0x33   :  { %556 = vsyncadd [#allocation9], 4294967280 }
  0x34   :  { %70 = sfence }
  0x35   :  { %s72_s4 = sld [smem:[#allocation2]]  ;;  %s407_s13 = sld [smem:[#allocation2 + $0x1]]  ;;  %v614_v0 = vld [vmem:[%s811_s0] sm:$0xff]  ;;  %vm360_vm0 = vcmask 1040384  }
  0x36   :  { %s405_s12 = sld [smem:[#allocation2 + $0x80]]  ;;  %s408_s15 = sld [smem:[#allocation2 + $0x81]] }
  0x37   :  { %s609_s14 = sld [smem:[#allocation5]]  ;;  %s411_s16 = sld [smem:[#allocation2 + $0x2]] }
  0x38   :  { %s412_s17 = sld [smem:[#allocation2 + $0x82]]  ;;  %s616_s20 = sld [smem:[#allocation5 + $0x1]] }
  0x39   :  { %s618_s21 = sld [smem:[#allocation2 + $0x3]]  ;;  %s620_s22 = sld [smem:[#allocation5 + $0x2]] }
  0x3a   :  { %s416_s23 = sld [smem:[#allocation2 + $0x83]]  ;;  %s622_s24 = sld [smem:[#allocation2 + $0x4]] }
  0x3b   :  { %v73_v1 = vstv %s72_s4  ;;  %s624_s25 = sld [smem:[#allocation2 + $0x84]]  ;;  %v88_v5 = vstv %s407_s13  ;;  %s628_s0 = sld [smem:[#allocation2 + $0x5]] }
  0x3c   :  { %v76_v2 = vstv %s405_s12  ;;  %v74_v3 = vmul.f32 %v73_v1, %v614_v0  ;;  %v89_v6 = vmul.f32 %v88_v5, %v614_v0  ;;  %v91_v7 = vstv %s408_s15  ;;  %s631_s26 = sld [smem:[#allocation2 + $0x85]]  ;;  %s634_s2 = sld [smem:[#allocation2 + $0x6]] }
  0x3d   :  { %v77_v4 = vmul.f32 %v76_v2, %v614_v0  ;;  %v92_v9 = vmul.f32 %v91_v7, %v614_v0  ;;  %v103_v10 = vstv %s411_s16  ;;  %s639_s1 = sld [smem:[#allocation5 + $0x3]]  ;;  %s641_s27 = sld [smem:[#allocation5 + $0x4]]  ;;  %v84_v16 = vstv %s609_s14 }
  0x3e   :  { %v106_v11 = vstv %s412_s17  ;;  %v104_v12 = vmul.f32 %v103_v10, %v614_v0  ;;  %s644_s28 = sld [smem:[#allocation2 + $0x86]]  ;;  %s646_s29 = sld [smem:[#allocation2 + $0x7]]  ;;  %v99_v19 = vstv %s616_s20 }
  0x3f   :  { %v406_v8 = vrot.slane %v77_v4, 9  ;;  %v107_v13 = vmul.f32 %v106_v11, %v614_v0  ;;  %v118_v14 = vstv %s618_s21  ;;  %v409_v17 = vrot.slane %v92_v9, 9  ;;  %s651_s30 = sld [smem:[#allocation5 + $0x5]]  ;;  %s656_s6 = sld [smem:[#allocation2 + $0x87]] }
  0x40   :  { %v121_v18 = vstv %s416_s23  ;;  %v133_v22 = vstv %s622_s24  ;;  %v114_v24 = vstv %s620_s22  ;;  %v119_v25 = vmul.f32 %v118_v14, %v614_v0  ;;  %s661_s7 = sld [smem:[#allocation5 + $0x6]]  ;;  %s663_s8 = sld [smem:[#allocation2 + $0x8]] }
  0x41   :  { %v82_v15 = vadd.f32 %v406_v8, %v74_v3  ;;  %v413_v20 = vrot.slane %v107_v13, 9  ;;  %v122_v21 = vmul.f32 %v121_v18, %v614_v0  ;;  %v97_v23 = vadd.f32 %v409_v17, %v89_v6  ;;  %s668_s9 = sld [smem:[#allocation2 + $0x88]]  ;;  %s670_s10 = sld [smem:[#allocation2 + $0x9]] }
  0x42   :  { %v136_v26 = vstv %s624_s25  ;;  %v134_v31 = vmul.f32 %v133_v22, %v614_v0  ;;  %v148_v32 = vstv %s628_s0  ;;  %v151_v33 = vstv %s631_s26  ;;  %s676_s11 = sld [smem:[#allocation5 + $0x7]]  ;;  %s681_s3 = sld [smem:[#allocation2 + $0x89]] }
  0x43   :  { %v658_v27 = vadd.f32 %v84_v16, %v82_v15  ;;  %v112_v28 = vadd.f32 %v413_v20, %v104_v12  ;;  %v417_v29 = vrot.slane %v122_v21, 9  ;;  %v137_v30 = vmul.f32 %v136_v26, %v614_v0  ;;  %s683_s4 = sld [smem:[#allocation7]]  ;;  %s716_s17 = sld [smem:[#allocation5 + $0x9]] }
  0x44   :  { %v672_v34 = vadd.f32 %v99_v19, %v97_v23  ;;  %v149_v38 = vmul.f32 %v148_v32, %v614_v0  ;;  %v152_v39 = vmul.f32 %v151_v33, %v614_v0  ;;  %v163_v40 = vstv %s634_s2  ;;  %s690_s12 = sld [smem:[#allocation7 + $0x80]]  ;;  %s731_s20 = sld [smem:[#allocation7 + $0x1]] }
  0x45   :  { %v674_v35 = vadd.f32 %v114_v24, %v112_v28  ;;  %v421_v36 = vrot.slane %v137_v30, 9  ;;  %v127_v37 = vadd.f32 %v417_v29, %v119_v25  ;;  %v86_v41 = vmax.f32 %v658_v27, 0.0  ;;  %s692_s13 = sld [smem:[#allocation7 + $0x100]]  ;;  %s738_s21 = sld [smem:[#allocation7 + $0x81]] }
  0x46   :  { %v129_v42 = vstv %s639_s1  ;;  %v144_v43 = vstv %s641_s27  ;;  %v425_v45 = vrot.slane %v152_v39, 9  ;;  %v166_v46 = vstv %s644_s28  ;;  %s698_s14 = sld [smem:[#allocation7 + $0x180]]  ;;  %s740_s22 = sld [smem:[#allocation7 + $0x101]] }
  0x47   :  { %v142_v44 = vadd.f32 %v421_v36, %v134_v31  ;;  %v178_v47 = vstv %s646_s29  ;;  %v101_v48 = vmax.f32 %v672_v34, 0.0  ;;  %v159_v49 = vstv %s651_s30  ;;  %s707_s15 = sld [smem:[#allocation5 + $0x8]]  ;;  %s748_s24 = sld [smem:[#allocation7 + $0x181]] }
  0x48   :  { %v164_v50 = vmul.f32 %v163_v40, %v614_v0  ;;  %v167_v51 = vmul.f32 %v166_v46, %v614_v0  ;;  %v116_v52 = vmax.f32 %v674_v35, 0.0  ;;  %v701_v53 = vadd.f32 %v129_v42, %v127_v37  ;;  %s709_s16 = sld [smem:[#allocation7 + $0x200]]  ;;  %s756_s25 = sld [smem:[#allocation7 + $0x201]] }
  0x49   :  { %v157_v54 = vadd.f32 %v425_v45, %v149_v38  ;;  %v181_v55 = vstv %s656_s6  ;;  %v179_v57 = vmul.f32 %v178_v47, %v614_v0  ;;  %v193_v59 = vstv %s663_s8  ;;  %s718_s18 = sld [smem:[#allocation7 + $0x280]]  ;;  %s765_s26 = sld [smem:[#allocation7 + $0x281]] }
  0x4a   :  { %v429_v56 = vrot.slane %v167_v51, 9  ;;  %v182_v58 = vmul.f32 %v181_v55, %v614_v0  ;;  %v711_v60 = vadd.f32 %v144_v43, %v142_v44  ;;  %v174_v61 = vstv %s661_s7  ;;  %s729_s19 = sld [smem:[#allocation7 + $0x300]]  ;;  %s771_s1 = sld [smem:[#allocation7 + $0x301]] }
  0x4b   :  { %v196_v62 = vstv %s668_s9  ;;  %v208_v63 = vstv %s670_s10  ;;  %v189_v3 = vstv %s676_s11  ;;  %v722_v5 = vadd.f32 %v159_v49, %v157_v54  ;;  %s746_s23 = sld [smem:[#allocation7 + $0x380]]  ;;  %s779_s27 = sld [smem:[#allocation7 + $0x381]] }
  0x4c   :  { %v172_v1 = vadd.f32 %v429_v56, %v164_v50  ;;  %v433_v2 = vrot.slane %v182_v58, 9  ;;  %v197_v4 = vmul.f32 %v196_v62, %v614_v0  ;;  %v194_v6 = vmul.f32 %v193_v59, %v614_v0  ;;  %s761_s0 = sld [smem:[#allocation7 + $0x400]]  ;;  %s788_s28 = sld [smem:[#allocation7 + $0x401]] }
  0x4d   :  { %v211_v7 = vstv %s681_s3  ;;  %v223_v8 = vstv %s683_s4  ;;  %v209_v11 = vmul.f32 %v208_v63, %v614_v0  ;;  %v131_v13 = vmax.f32 %v701_v53, 0.0  ;;  %s768_s2 = sld [smem:[#allocation7 + $0x480]]  ;;  %s462_s30 = sld [smem:[#allocation7 + $0x481]] }
  0x4e   :  { %v187_v9 = vadd.f32 %v433_v2, %v179_v57  ;;  %v437_v10 = vrot.slane %v197_v4, 9  ;;  %v212_v12 = vmul.f32 %v211_v7, %v614_v0  ;;  %v224_v14 = vmul.f32 %v223_v8, %v86_v41  ;;  %s791_s29 = sld [smem:[#allocation8]]  ;;  %s463_s6 = sld [smem:[#allocation8 + $0x1]] }
  0x4f   :  { %v226_v15 = vstv %s690_s12  ;;  %v230_v16 = vstv %s692_s13  ;;  %v146_v17 = vmax.f32 %v711_v60, 0.0  ;;  %v743_v0 = vadd.f32 %v174_v61, %v172_v1  ;;  %s566_s7 = smov [#allocation10]  }
  0x50   :  { %v441_v18 = vrot.slane %v212_v12, 9  ;;  %v234_v19 = vstv %s698_s14  ;;  %v750_v20 = vadd.f32 %v189_v3, %v187_v9  ;;  %v202_v21 = vadd.f32 %v437_v10, %v194_v6  ;;  %s394_s8 = sshll.u32 %s566_s7, 4  ;;  %s395_s8 = int_to_ptr.vmem [resolvable:$true] %s394_s8 }
  0x51   :  { %v227_v22 = vmul.f32 %v226_v15, %v101_v48  ;;  %v231_v23 = vmul.f32 %v230_v16, %v116_v52  ;;  %v161_v24 = vmax.f32 %v722_v5, 0.0  ;;  %v204_v25 = vstv %s707_s15  ;;  %s529_s9 = scalar_lea.vmem %s395_s8, 128  ;;  %p534_p7 = scmp.lt.s32.totalorder %s395_s8, %s395_s8 }
  0x52   :  { %v217_v26 = vadd.f32 %v441_v18, %v209_v11  ;;  %v238_v28 = vstv %s709_s16  ;;  %v219_v29 = vstv %s716_s17  ;;  %v235_v31 = vmul.f32 %v234_v19, %v131_v13  ;;  %p530_p6 = scmp.ne.s32.totalorder %s395_s8, %s529_s9  ;;  %p535_p8 = scmp.lt.s32.totalorder %s529_s9, %s529_s9 }
  0x53   :  { %v228_v30 = vadd.f32 %v227_v22, %v224_v14  ;;  %v242_v32 = vstv %s718_s18  ;;  %v176_v33 = vmax.f32 %v743_v0, 0.0  ;;  %v191_v36 = vmax.f32 %v750_v20, 0.0 }
  0x54   :  { %v205_v37 = vadd.f32 %v204_v25, %v202_v21  ;;  %v239_v39 = vmul.f32 %v238_v28, %v146_v17  ;;  %v220_v40 = vadd.f32 %v219_v29, %v217_v26  ;;  %v243_v42 = vmul.f32 %v242_v32, %v161_v24  ;;  %p536_p9 = por %p535_p8, %p534_p7 }
  0x55   :  { %v232_v38 = vadd.f32 %v231_v23, %v228_v30  ;;  %v246_v43 = vstv %s729_s19  ;;  %v271_v44 = vstv %s731_s20  ;;  %v274_v47 = vstv %s738_s21 }
  0x56   :  { %v272_v46 = vmul.f32 %v271_v44, %v86_v41  ;;  %v278_v49 = vstv %s740_s22  ;;  %v250_v50 = vstv %s746_s23  ;;  %v275_v51 = vmul.f32 %v274_v47, %v101_v48  ;;  %p537_p10 = pnand %p536_p9, %p530_p6 }
  0x57   :  { %v236_v45 = vadd.f32 %v235_v31, %v232_v38  ;;  %v279_v53 = vmul.f32 %v278_v49, %v116_v52  ;;  %v282_v54 = vstv %s748_s24  ;;  %v206_v55 = vmax.f32 %v205_v37, 0.0 }
  0x58   :  { %v247_v57 = vmul.f32 %v246_v43, %v176_v33  ;;  %v286_v58 = vstv %s756_s25  ;;  %v254_v27 = vstv %s761_s0  ;;  %v276_v41 = vadd.f32 %v275_v51, %v272_v46 }
  0x59   :  { %v240_v56 = vadd.f32 %v239_v39, %v236_v45  ;;  %v283_v59 = vmul.f32 %v282_v54, %v131_v13  ;;  %v221_v34 = vmax.f32 %v220_v40, 0.0  ;;  %v251_v60 = vmul.f32 %v250_v50, %v191_v36 }
  0x5a   :  { %v290_v35 = vstv %s765_s26  ;;  %v258_v52 = vstv %s768_s2  ;;  %v280_v61 = vadd.f32 %v279_v53, %v276_v41  ;;  %v287_v62 = vmul.f32 %v286_v58, %v146_v17 }
  0x5b   :  { %v244_v48 = vadd.f32 %v243_v42, %v240_v56  ;;  %v255_v1 = vmul.f32 %v254_v27, %v206_v55  ;;  %v294_v2 = vstv %s771_s1  ;;  %v291_v4 = vmul.f32 %v290_v35, %v161_v24 }
  0x5c   :  { %v284_v3 = vadd.f32 %v283_v59, %v280_v61  ;;  %v259_v6 = vmul.f32 %v258_v52, %v221_v34  ;;  %v298_v7 = vstv %s779_s27  ;;  %v295_v9 = vmul.f32 %v294_v2, %v176_v33 }
  0x5d   :  { %v248_v63 = vadd.f32 %v247_v57, %v244_v48  ;;  %v302_v11 = vstv %s788_s28  ;;  %v262_v12 = vstv %s791_s29  ;;  %v299_v14 = vmul.f32 %v298_v7, %v191_v36 }
  0x5e   :  { %v288_v8 = vadd.f32 %v287_v62, %v284_v3  ;;  %v306_v16 = vstv %s462_s30  ;;  %v303_v17 = vmul.f32 %v302_v11, %v206_v55  ;;  %v310_v23 = vstv %s463_s6 }
  0x5f   :  { %v252_v5 = vadd.f32 %v251_v60, %v248_v63  ;;  %v307_v20 = vmul.f32 %v306_v16, %v221_v34  ;;  %v319_v31 = vlaneseq  ;;  %v565_v36 = vmov 1983009808  }
  0x60   :  { %v292_v13 = vadd.f32 %v291_v4, %v288_v8  ;;  %v372_v37 = vunpack.c.l.s4 %v565_v36 }
  0x61   :  { %v256_v10 = vadd.f32 %v255_v1, %v252_v5  ;;  %v320_v33 = vshrl.u32 %v319_v31, 7 }
  0x62   :  { %v296_v0 = vadd.f32 %v295_v9, %v292_v13  ;;  %v373_v44 = vunpack.c.0.s8 %v372_v37 }
  0x63   :  { %v260_v15 = vadd.f32 %v259_v6, %v256_v10  ;;  %v321_v38 = vsub.s32 0, %v320_v33  ;;  %v325_v39 = vsub.s32 2, %v320_v33  ;;  %v329_v40 = vsub.s32 4, %v320_v33 }
  0x64   :  { %v300_v19 = vadd.f32 %v299_v14, %v296_v0  ;;  %v333_v42 = vsub.s32 6, %v320_v33  ;;  %v376_v56 = vsub.s32 %v373_v44, %v320_v33 }
  0x65   :  { %v263_v18 = vadd.f32 %v262_v12, %v260_v15 }
  0x66   :  { %v304_v22 = vadd.f32 %v303_v17, %v300_v19 }
  0x67   :  { %v452_v21 = vmul.f32 -1.442695, %v263_v18 }
  0x68   :  { %v308_v24 = vadd.f32 %v307_v20, %v304_v22 }
  0x69   :  { %473 = vpow2.f32 %v452_v21 }
  0x6a   :  { %v311_v25 = vadd.f32 %v310_v23, %v308_v24 }
  0x6c   :  { %v464_v26 = vmul.f32 -1.442695, %v311_v25 }
  0x6e   :  { %475 = vpow2.f32 %v464_v26 }
  0x73   :  { %v474_v28 = vpop.eup %473 }
  0x74   :  { %v267_v29 = vadd.f32 1.0, %v474_v28 }
  0x76   :  { %477 = vrcp.f32 %v267_v29 }
  0x78   :  { %v476_v30 = vpop.eup %475 }
  0x79   :  { %v315_v32 = vadd.f32 1.0, %v476_v30 }
  0x7b   :  { %479 = vrcp.f32 %v315_v32 }
  0x80   :  { %v478_v43 = vpop.eup %477 }
  0x81   :  { %v322_v45 = vrot.slane %v478_v43, %v321_v38  ;;  %v326_v46 = vrot.slane %v478_v43, %v325_v39  ;;  %v330_v47 = vrot.slane %v478_v43, %v329_v40  ;;  %v334_v49 = vrot.slane %v478_v43, %v333_v42 }
  0x85   :  { %v480_v50 = vpop.eup %479 }
  0x86   :  { %v343_v51 = vrot.slane %v480_v50, %v321_v38  ;;  %v347_v53 = vrot.slane %v480_v50, %v325_v39  ;;  %v351_v54 = vrot.slane %v480_v50, %v329_v40  ;;  %v355_v55 = vrot.slane %v480_v50, %v333_v42 }
  0x88   :  { %v361_v57 = vsel %vm360_vm0, %v322_v45, %v343_v51  ;;  %v362_v58 = vsel %vm360_vm0, %v326_v46, %v347_v53  ;;  %v363_v27 = vsel %vm360_vm0, %v330_v47, %v351_v54  ;;  %v364_v41 = vsel %vm360_vm0, %v334_v49, %v355_v55 }
  0x89   :  { %v369_v59 = vcombine.low %v361_v57, %v362_v58  ;;  %v370_v34 = vcombine.low %v363_v27, %v364_v41 }
  0x8b   :  { %v377_v48 = vrot.slane %v369_v59, %v376_v56  ;;  %v384_v60 = vrot.slane %v370_v34, %v376_v56 }
  0x8d   :  { %v385_v35 = vcombine.low %v377_v48, %v384_v60 }
  0x8f   :  { %387 = vst [vmem:[#allocation10] sm:$0xff] %v385_v35 }
  0x90   :  { %540 = shalt.err (!%p537_p10)
}
  0x91   :  { %s541_s3 = scalar_lea.hbm %s816_s5, 128 }
  0x92   :  { %p542_p11 = scmp.ne.s32.totalorder %s816_s5, %s541_s3  ;;  %p545_p12 = scmp.lt.u32.totalorder %s541_s3, %s816_s5 }
  0x94   :  { %p547_p13 = pnand %p545_p12, %p542_p11 }
  0x96   :  { %550 = shalt.err (!%p547_p13)
}
  0x97   :  { %397 = dma.vmem_to_hbm [thread:$0]  %s395_s8, 128, %s816_s5, [#allocation3]  }
  0x98   :  { %557 = dma.done.wait [#allocation3], 128  }
  0x99   :  { %558 = vsyncadd [#allocation3], 4294967168 }
  0x9a   :  { %401 = vsyncpa [#allocation3], 1 }
  0x9b   :  { %402 = vsyncpa [#allocation4], 1 }
  0x9c   :  { %403 = vsyncpa [#allocation6], 1 }
  0x9d   :  { %404 = vsyncpa [#allocation9], 1 }

</bundles_post_ra>
